<compile_context>
chip_gen: v7x
topology: tpu7x:2x2x1
jax: 0.10.0
libtpu: 0.0.40
codegen_flags: <defaults>
</compile_context>

<pallas_src>
import functools
import math

import jax
import jax.numpy as jnp
from jax.experimental import pallas as pl
from jax.experimental.pallas import tpu as pltpu


_SLAB_COLS = 1024      # 8 lane-groups per row: lane-dense, (8,128)-aligned


# --------------------------------------------------------------------------- #
# Generation-aware sizing
# --------------------------------------------------------------------------- #
@functools.lru_cache(maxsize=None)
def _vmem_limit_bytes():
    """Scoped-VMEM budget derived from the chip (v7x: 64 MiB phys, v5e/v6e: 128)."""
    try:
        cap = int(pltpu.get_tpu_info().vmem_capacity_bytes)
    except Exception:
        cap = 64 * 1024 * 1024          # conservative default (v7x)
    # ~62% of physical VMEM, capped: 40 MiB on v7x, 80 MiB on v5e/v6e.
    return min(cap * 5 // 8, 100 * 1024 * 1024)


def _pick_cols(n):
    """Largest lane-dense width that divides n (free reshape, no HBM copy)."""
    for c in (1024, 512, 256, 128):
        if n % c == 0:
            return c, False
    return _SLAB_COLS, True             # rare: unaligned size -> pad fallback


def _pick_tile_rows(rows, cols, n_tiled_bufs, max_itemsize):
    """Per-step tile rows: a few MiB per double-buffered operand, balanced."""
    budget = (_vmem_limit_bytes() * 3) // 5             # leave compiler headroom
    per_buf = max(budget // (2 * n_tiled_bufs), 8 * cols * max_itemsize)
    tr = max(8, (per_buf // (cols * max_itemsize)) // 8 * 8)
    if rows <= tr:
        return rows                                      # full extent (any value ok)
    steps = pl.cdiv(rows, tr)                            # balance the last tile
    return ((pl.cdiv(rows, steps) + 7) // 8) * 8


def _batched_index_map(ndim, bax):
    if bax is None:
        return lambda i: (0,) * ndim
    return lambda i: tuple(i if d == bax else 0 for d in range(ndim))


class LambdaLayer:
    """Pallas port of verl.utils.model.LambdaLayer: forward(*args) = fn(*args).

    Optional hints (perf only, semantics unchanged):
      elementwise=True  -> tiled lane-dense pipelined path (fn must be
                           shape-agnostic / broadcasting elementwise).
      batch_axis=k      -> generic path tiles operands along axis k of the
                           output (fn must be independent along that axis).
    """

    # TODO(synk): **kwargs / non-array positional args are not routed through
    # the kernel; the PyTorch module forwards them blindly to fn.

    def __init__(self, fn, *, elementwise=False, batch_axis=None,
                 out_batch_axis=None, cost_estimate=None):
        self.fn = fn
        self.elementwise = elementwise
        self.batch_axis = batch_axis
        self.out_batch_axis = batch_axis if out_batch_axis is None else out_batch_axis
        self.cost_estimate = cost_estimate

    def __call__(self, *args):
        args = tuple(jnp.asarray(a) for a in args)
        if self.elementwise:
            return self._call_elementwise(*args)
        return self._call_generic(*args)

    # ------------------------------------------------------------------ #
    # Cost estimate (advisory; exact bytes, rough flops)
    # ------------------------------------------------------------------ #
    def _cost(self, call_args, out_shape, out_dtype):
        if self.cost_estimate is not None:
            return self.cost_estimate
        out_elems = max(math.prod(out_shape), 1) if out_shape else 1
        nbytes = sum(math.prod(a.shape) * a.dtype.itemsize for a in call_args)
        nbytes += out_elems * jnp.dtype(out_dtype).itemsize
        return pl.CostEstimate(flops=int(out_elems * max(len(call_args), 1)),
                               transcendentals=0,
                               bytes_accessed=int(nbytes))

    # ------------------------------------------------------------------ #
    # Elementwise path: tiled, pipelined, lane-dense, copy-free wrapper.
    # ------------------------------------------------------------------ #
    def _call_elementwise(self, *args):
        out_sds = jax.eval_shape(self.fn, *args)
        assert not isinstance(out_sds, (tuple, list)), "single-output fns only"
        shape = jnp.broadcast_shapes(*(a.shape for a in args))
        assert out_sds.shape == shape, "elementwise fn must keep the broadcast shape"
        n = math.prod(shape) if shape else 1
        if n < 128:
            return self._generic_whole(args, out_sds)    # too small to tile

        cols, needs_pad = _pick_cols(n)
        n_pad = pl.cdiv(n, cols) * cols
        rows = n_pad // cols

        # Per-operand routing: full-size operands -> lane-dense (rows, cols)
        # slabs (pure reshape when no pad needed, no HBM copy); size-1 operands
        # -> SMEM / (1,1) VMEM block, broadcast inside the kernel.
        plans = []   # (kind, call_value, spec_or_None, created_fresh_buffer)
        for a in args:
            if a.size == 1:
                if a.dtype.itemsize == 4:
                    plans.append(("smem", a.reshape(1),
                                  pl.BlockSpec(memory_space=pltpu.MemorySpace.SMEM),
                                  False))
                else:
                    plans.append(("scalar2d", a.reshape(1, 1),
                                  pl.BlockSpec((1, 1), lambda i: (0, 0)),
                                  False))
                continue
            created = False
            if a.shape != shape:
                # TODO(synk): per-channel (non-scalar, non-full) operands still
                # materialize an HBM broadcast; avoiding it needs structural hints.
                a = jnp.broadcast_to(a, shape)
                created = True
            f = a.reshape(-1)
            if needs_pad:
                f = jnp.pad(f, (0, n_pad - n))            # rare, unaligned sizes only
                created = True
            plans.append(("tile", f.reshape(rows, cols), None, created))

        tiled_vals = [v for (k, v, _, _) in plans if k == "tile"]
        max_itemsize = max([jnp.dtype(out_sds.dtype).itemsize]
                           + [v.dtype.itemsize for v in tiled_vals])
        tile_rows = _pick_tile_rows(rows, cols, len(tiled_vals) + 1, max_itemsize)

        # TODO(synk): pipeline_mode=pl.Buffered(3) on this spec is a candidate
        # few-percent win (hides DMA-issue latency); sweep per generation.
        tile_spec = pl.BlockSpec((tile_rows, cols), lambda i: (i, 0))
        in_specs = [tile_spec if k == "tile" else s for (k, _, s, _) in plans]
        call_args = [v for (_, v, _, _) in plans]

        # Alias input->output only when the wrapper created that buffer itself
        # (pad/broadcast copy) -- never a view of the caller's array.
        aliases = {}
        for idx, (k, v, _, created) in enumerate(plans):
            if k == "tile" and created and v.dtype == out_sds.dtype:
                aliases = {idx: 0}
                break

        kinds = [p[0] for p in plans]
        fn = self.fn

        def kernel(*refs):
            in_refs, out_ref = refs[:-1], refs[-1]
            vals = []
            for r, kind in zip(in_refs, kinds):
                if kind == "smem":
                    vals.append(r[0])
                elif kind == "scalar2d":
                    vals.append(r[0, 0])
                else:
                    vals.append(r[...])
            out_ref[...] = fn(*vals).astype(out_ref.dtype)

        out = pl.pallas_call(
            kernel,
            out_shape=jax.ShapeDtypeStruct((rows, cols), out_sds.dtype),
            grid=(pl.cdiv(rows, tile_rows),),
            in_specs=in_specs,
            out_specs=tile_spec,
            input_output_aliases=aliases,
            compiler_params=pltpu.CompilerParams(
                dimension_semantics=("parallel",),        # megacore split on v7x
                vmem_limit_bytes=_vmem_limit_bytes(),
            ),
            cost_estimate=self._cost(call_args, (rows, cols), out_sds.dtype),
        )(*call_args)

        out = out.reshape(-1)
        if n_pad != n:
            out = out[:n]
        return out.reshape(out_sds.shape)

    # ------------------------------------------------------------------ #
    # Generic path
    # ------------------------------------------------------------------ #
    def _call_generic(self, *args):
        out_sds = jax.eval_shape(self.fn, *args)
        assert not isinstance(out_sds, (tuple, list)), "single-output fns only"
        if self.batch_axis is None:
            return self._generic_whole(args, out_sds)
        return self._generic_batched(args, out_sds)

    def _scalar_plan(self, a):
        """Size-1 operand -> SMEM (32-bit, or f32-carried for sub-32-bit)."""
        if a.dtype.itemsize < 4:
            return ("smem", a.shape, a.dtype, a.reshape(1).astype(jnp.float32),
                    pl.BlockSpec(memory_space=pltpu.MemorySpace.SMEM))
        if a.dtype.itemsize == 4:
            return ("smem", a.shape, a.dtype, a.reshape(1),
                    pl.BlockSpec(memory_space=pltpu.MemorySpace.SMEM))
        return ("scalar2d", a.shape, a.dtype, a.reshape(1, 1),
                pl.BlockSpec((1, 1), lambda i: (0, 0)))

    def _generic_whole(self, args, out_sds):
        # TODO(synk): an arbitrary fn cannot be tiled safely without a
        # batch_axis hint, so whole operands must fit the scoped-VMEM budget.
        meta, call_args, in_specs = [], [], []
        for a in args:
            if a.size == 1:
                kind, shp, dt, val, spec = self._scalar_plan(a)
                meta.append((kind, shp, dt))
                call_args.append(val)
                in_specs.append(spec)
            else:
                meta.append(("vmem", a.shape, a.dtype))
                call_args.append(a)
                in_specs.append(pl.BlockSpec(memory_space=pltpu.MemorySpace.VMEM))
        fn = self.fn

        def kernel(*refs):
            in_refs, out_ref = refs[:-1], refs[-1]
            vals = []
            for r, (kind, shp, dt) in zip(in_refs, meta):
                if kind == "smem":
                    vals.append(jnp.full(shp, r[0], dtype=dt))
                elif kind == "scalar2d":
                    vals.append(jnp.full(shp, r[0, 0], dtype=dt))
                else:
                    vals.append(r[...])
            out_ref[...] = fn(*vals).astype(out_ref.dtype)

        # TODO(synk): reduction-style fns with a narrow last output dim pay
        # masked vst.msk stores; a lane-dense output fold needs fn structure.
        return pl.pallas_call(
            kernel,
            out_shape=jax.ShapeDtypeStruct(out_sds.shape, out_sds.dtype),
            in_specs=in_specs,
            out_specs=pl.BlockSpec(memory_space=pltpu.MemorySpace.VMEM),
            compiler_params=pltpu.CompilerParams(vmem_limit_bytes=_vmem_limit_bytes()),
            cost_estimate=self._cost(call_args, out_sds.shape, out_sds.dtype),
        )(*call_args)

    def _generic_batched(self, args, out_sds):
        bax, obax = self.batch_axis, self.out_batch_axis
        out_shape, out_dtype = out_sds.shape, out_sds.dtype
        assert 0 <= obax < len(out_shape), "out_batch_axis out of range"
        B = out_shape[obax]

        def tiled(a):
            return a.size > 1 and a.ndim > bax and a.shape[bax] == B

        # Bytes per batch element of the biggest tiled operand -> block size.
        per_b = max(
            [math.prod(out_shape) // max(B, 1) * jnp.dtype(out_dtype).itemsize]
            + [a.size // B * a.dtype.itemsize for a in args if tiled(a)])

        # Alignment when the batch axis lands in an operand's last two dims.
        def need(ndim, ax):
            if ndim - ax == 1:
                return 128
            if ndim - ax == 2:
                return 8
            return 1
        req = need(len(out_shape), obax)
        for a in args:
            if tiled(a):
                r = need(a.ndim, bax)
                req = req * r // math.gcd(req, r)

        target = max(_vmem_limit_bytes() // 8, per_b)     # a few MiB per step
        block_b = max(1, min(B, target // per_b))
        if block_b < B:
            block_b = (block_b // req) * req
            if block_b == 0:
                block_b = B          # cannot tile legally at this B -> one block

        meta, call_args, in_specs = [], [], []
        for a in args:
            if a.size == 1:
                kind, shp, dt, val, spec = self._scalar_plan(a)
                meta.append((kind, shp, dt))
                call_args.append(val)
                in_specs.append(spec)
            elif tiled(a):
                blk = tuple(block_b if d == bax else s for d, s in enumerate(a.shape))
                meta.append(("vmem", a.shape, a.dtype))
                call_args.append(a)
                in_specs.append(pl.BlockSpec(blk, _batched_index_map(a.ndim, bax)))
            else:
                meta.append(("vmem", a.shape, a.dtype))
                call_args.append(a)
                in_specs.append(pl.BlockSpec(a.shape, _batched_index_map(a.ndim, None)))

        out_blk = tuple(block_b if d == obax else s for d, s in enumerate(out_shape))
        out_spec = pl.BlockSpec(out_blk, _batched_index_map(len(out_shape), obax))
        fn = self.fn

        def kernel(*refs):
            in_refs, out_ref = refs[:-1], refs[-1]
            vals = []
            for r, (kind, shp, dt) in zip(in_refs, meta):
                if kind == "smem":
                    vals.append(jnp.full(shp, r[0], dtype=dt))
                elif kind == "scalar2d":
                    vals.append(jnp.full(shp, r[0, 0], dtype=dt))
                else:
                    vals.append(r[...])
            out_ref[...] = fn(*vals).astype(out_ref.dtype)

        return pl.pallas_call(
            kernel,
            out_shape=jax.ShapeDtypeStruct(out_shape, out_dtype),
            grid=(pl.cdiv(B, block_b),),
            in_specs=in_specs,
            out_specs=out_spec,
            compiler_params=pltpu.CompilerParams(
                dimension_semantics=("parallel",),        # 2 TCs on v7x
                vmem_limit_bytes=_vmem_limit_bytes(),
            ),
            cost_estimate=self._cost(call_args, out_shape, out_dtype),
        )(*call_args)


if __name__ == "__main__":
    key = jax.random.PRNGKey(0)
    k_h, k_w, k_b, k_x, k_s, k_p = jax.random.split(key, 6)
    B, S, H = 2, 8, 128

    # --- Demo 1: plain verl-style squeeze lambda (generic whole-operand path) -
    logits = jax.random.normal(k_p, (B, 1, S, H), dtype=jnp.float32)
    squeeze = LambdaLayer(lambda t: jnp.squeeze(t, axis=1))
    out1 = jax.block_until_ready(squeeze(logits))
    assert out1.shape == (B, S, H)
    assert jnp.allclose(out1, jnp.squeeze(logits, axis=1))

    # --- Demo 2: verl critic value head, batched generic path ----------------
    # squeeze(hidden @ W + b) fused into one kernel; bias rides through SMEM,
    # hidden is tiled over batch_axis=0 ("parallel" grid -> megacore on v7x).
    hidden = jax.random.normal(k_h, (B, S, H), dtype=jnp.float32)
    w = jax.random.normal(k_w, (H,), dtype=jnp.float32) * (H ** -0.5)
    b = jax.random.normal(k_b, (1,), dtype=jnp.float32)

    def value_head_fn(h, w, b):
        bb, ss, hh = h.shape
        if hh >= 512:
            # Production hidden sizes: run the reduction on the MXU.
            v = jnp.dot(h.reshape(bb * ss, hh), w.reshape(hh, 1),
                        preferred_element_type=jnp.float32).reshape(bb, ss)
        else:
            # Small demo H: VPU multiply + XLU lane reduce, no relayouts.
            v = jnp.sum(h * w, axis=-1)
        return v + b                    # b:(1,) arrives via SMEM scalar path

    value_head = LambdaLayer(value_head_fn, batch_axis=0)
    ref_v = value_head_fn(hidden, w, b)
    v = jax.block_until_ready(value_head(hidden, w, b))
    assert v.shape == (B, S) and v.dtype == jnp.float32
    assert jnp.allclose(v, ref_v, atol=1e-5, rtol=1e-5)

    # --- Demo 3: elementwise lambda (lane-dense slab, zero-copy reshape) -----
    x = jax.random.normal(k_x, (2, 4, 16, 16), dtype=jnp.float32)
    ref_y = x * jax.nn.sigmoid(1.702 * x)
    gelu_ish = LambdaLayer(lambda t: t * jax.nn.sigmoid(1.702 * t), elementwise=True)
    y = jax.block_until_ready(gelu_ish(x))
    assert y.shape == x.shape and y.dtype == x.dtype
    assert jnp.allclose(y, ref_y, atol=1e-5, rtol=1e-5)

    # --- Demo 4: elementwise with a scalar operand -> SMEM, no HBM broadcast -
    scale = jnp.float32(1.5)
    ref_z = x * scale
    scaled = LambdaLayer(lambda t, s: t * s, elementwise=True)
    z = jax.block_until_ready(scaled(x, scale))
    assert jnp.allclose(z, ref_z, atol=1e-6, rtol=1e-6)

    # --- Demo 5: unaligned element count -> pad fallback + safe aliasing -----
    xq = jax.random.normal(k_s, (8, 100), dtype=jnp.float32)
    ref_q = xq * 2.0 + 1.0
    affine = LambdaLayer(lambda t: t * 2.0 + 1.0, elementwise=True)
    q = jax.block_until_ready(affine(xq))
    assert q.shape == (8, 100)
    assert jnp.allclose(q, ref_q, atol=1e-6, rtol=1e-6)

    print("KERNEL_OK")
</pallas_src>

<mosaic_0001>
module attributes {stable_mosaic.version = 11 : i64} {
  func.func @kernel(%arg0: memref<2x1x8x128xf32, #tpu.memory_space<vmem>>, %arg1: memref<2x8x128xf32, #tpu.memory_space<vmem>>) attributes {dimension_semantics = [], scalar_prefetch = 0 : i64, scratch_operands = 0 : i64, tpu.core_type = #tpu.core_type<tc>} {
    %c0 = arith.constant 0 : index
    %c0_0 = arith.constant 0 : index
    %c0_1 = arith.constant 0 : index
    %c0_2 = arith.constant 0 : index
    %0 = vector.load %arg0[%c0, %c0_0, %c0_1, %c0_2] : memref<2x1x8x128xf32, #tpu.memory_space<vmem>>, vector<2x1x8x128xf32>
    %1 = vector.shape_cast %0 : vector<2x1x8x128xf32> to vector<2x8x128xf32>
    %c0_3 = arith.constant 0 : index
    %c0_4 = arith.constant 0 : index
    %c0_5 = arith.constant 0 : index
    %2 = vector.load %arg1[%c0_3, %c0_4, %c0_5] : memref<2x8x128xf32, #tpu.memory_space<vmem>>, vector<2x8x128xf32>
    tpu.vector_store %arg1[%c0_3, %c0_4, %c0_5], %1 {strides = array<i32>} : memref<2x8x128xf32, #tpu.memory_space<vmem>>, vector<2x8x128xf32>,
    return
  }
}

</mosaic_0001>

<bundles_post_ra>
// kernel: tpu_custom_call.1
= control target key start
LH: loop header
LB: loop body
LE: loop exit
PB: predicated region body
PF: predicated region fallthrough
CT: control target
= control target key end

     0   :  { %6 = vsyncpa [#allocation3], 0  ;;  %s134_s0 = inlined_call_operand.hbm [shape: f32[2,1,8,128], index: 0, kind: input, shape index: {}]   ;;  %s135_s1 = inlined_call_operand.hbm [shape: f32[2,8,128], index: 1, kind: output, shape index: {}]  }
   0x1   :  { %7 = vsyncpa [#allocation4], 0  ;;  %s96_s6 = smov [#allocation2]   ;;  %s48_s10 = scalar_lea.hbm %s134_s0, 256 }
   0x2   :  { %s13_s7 = sshll.u32 %s96_s6, 4  ;;  %p49_p0 = scmp.ne.s32.totalorder %s134_s0, %s48_s10  ;;  %s14_s7 = int_to_ptr.vmem [resolvable:$true] %s13_s7 }
   0x3   :  { %p52_p1 = scmp.lt.u32.totalorder %s48_s10, %s134_s0 }
   0x5   :  { %p54_p2 = pnand %p52_p1, %p49_p0 }
   0x7   :  { %57 = shalt.err (!%p54_p2)
}
   0x8   :  { %s58_s15 = scalar_lea.vmem %s14_s7, 256  ;;  %p63_p4 = scmp.lt.s32.totalorder %s14_s7, %s14_s7 }
   0x9   :  { %p59_p3 = scmp.ne.s32.totalorder %s14_s7, %s58_s15  ;;  %p64_p5 = scmp.lt.s32.totalorder %s58_s15, %s58_s15 }
   0xb   :  { %p65_p6 = por %p64_p5, %p63_p4 }
   0xd   :  { %p66_p7 = pnand %p65_p6, %p59_p3 }
   0xf   :  { %69 = shalt.err (!%p66_p7)
}
  0x10   :  { %s97_s16 = smov 128   ;;  %s98_s17 = smov 8  }
  0x11   :  { %19 = dma.hbm_to_vmem [thread:$0]  %s134_s0, 256, %s14_s7, [#allocation3], %s97_s16, %s97_s16, %s98_s17  }
  0x12   :  { %92 = dma.done.wait [#allocation3], 256  }
  0x13   :  { %93 = vsyncadd [#allocation3], 4294967040  ;;  %s99_s20 = smov [#allocation5]   ;;  %v23_v0 = vld [vmem:[#allocation2] sm:$0xff]  ;;  %v24_v1 = vld [vmem:[#allocation2 + $0x8] sm:$0xff] }
  0x14   :  { %s32_s21 = sshll.u32 %s99_s20, 4  ;;  %25 = vst [vmem:[#allocation5] sm:$0xff] %v23_v0  ;;  %26 = vst [vmem:[#allocation5 + $0x8] sm:$0xff] %v24_v1  ;;  %s33_s21 = int_to_ptr.vmem [resolvable:$true] %s32_s21 }
  0x15   :  { %s70_s22 = scalar_lea.vmem %s33_s21, 256  ;;  %p75_p9 = scmp.lt.s32.totalorder %s33_s21, %s33_s21 }
  0x16   :  { %p71_p8 = scmp.ne.s32.totalorder %s33_s21, %s70_s22  ;;  %p76_p10 = scmp.lt.s32.totalorder %s70_s22, %s70_s22 }
  0x18   :  { %p77_p11 = por %p76_p10, %p75_p9 }
  0x1a   :  { %p78_p12 = pnand %p77_p11, %p71_p8 }
  0x1c   :  { %81 = shalt.err (!%p78_p12)
}
  0x1d   :  { %s82_s0 = scalar_lea.hbm %s135_s1, 256 }
  0x1e   :  { %p83_p13 = scmp.ne.s32.totalorder %s135_s1, %s82_s0  ;;  %p86_p0 = scmp.lt.u32.totalorder %s82_s0, %s135_s1 }
  0x20   :  { %p88_p1 = pnand %p86_p0, %p83_p13 }
  0x22   :  { %91 = shalt.err (!%p88_p1)
}
  0x23   :  { %38 = dma.vmem_to_hbm [thread:$0]  %s33_s21, 256, %s135_s1, [#allocation4], %s97_s16, %s97_s16, %s98_s17  }
  0x24   :  { %94 = dma.done.wait [#allocation4], 256  }
  0x25   :  { %95 = vsyncadd [#allocation4], 4294967040 }
  0x26   :  { %42 = vsyncpa [#allocation3], 1 }
  0x27   :  { %43 = vsyncpa [#allocation4], 1 }

</bundles_post_ra>
